<compile_context>
chip_gen: v7x
topology: tpu7x:2x2x1
jax: 0.10.0
libtpu: 0.0.40
codegen_flags: <defaults>
</compile_context>

<pallas_src>
import functools

import jax
import jax.numpy as jnp
from jax.experimental import pallas as pl
from jax.experimental.pallas import tpu as pltpu


def _round_up(x, m):
    return ((x + m - 1) // m) * m


def _cdiv(a, b):
    return (a + b - 1) // b


# -----------------------------------------------------------------------------
# Kernel
# -----------------------------------------------------------------------------
def _decoder_body(src, w_ref, out_ref, carry_ref, *, K, TK, KT_c, H, Hp):
    """One K-tile of: frames = W @ src ; 50% overlap-and-add along the frame axis."""
    c = pl.program_id(1)    # K-chunk index (core split); carry lives inside one chunk
    kt = pl.program_id(2)   # K-tile index within the chunk (serial / "arbitrary")

    # Reset the cross-tile overlap carry at the first tile of every (batch, chunk).
    @pl.when(kt == 0)
    def _():
        carry_ref[...] = jnp.zeros((H, 1), jnp.float32)

    # Inputs are NOT padded in HBM: zero the columns past the real frame count K.
    col0 = (c * KT_c + kt) * TK
    lane = jax.lax.broadcasted_iota(jnp.int32, (1, TK), 1)
    src = jnp.where(col0 + lane < K, src, jnp.zeros_like(src))

    w = w_ref[...]                              # [Lp, N], Lp = 2 * Hp
    src = src.astype(w.dtype)

    # One lane-dense MXU pass: [Lp, N] @ [N, TK] -> [Lp, TK] (frames stay in lanes).
    res = jax.lax.dot_general(w, src, (((1,), (0,)), ((), ())),
                              preferred_element_type=jnp.float32)
    first = res[:H]                             # frames[:, :H]^T
    second = res[Hp:Hp + H]                     # frames[:, H:]^T (sublane-aligned slice)

    # 50% overlap-and-add: out[:, j] = first[:, j] + second[:, j-1].
    shifted = pltpu.roll(second, 1, 1)          # col j <- second[:, j-1] (col 0 wraps)
    out_ref[0] = (first + shifted).astype(out_ref.dtype)
    # Fix column 0 with the half-frame carried in from the previous tile (1-lane store).
    out_ref[0, :, 0:1] = (first[:, 0:1] + carry_ref[...]).astype(out_ref.dtype)

    # Carry this tile's last half-frame into the next tile.
    carry_ref[...] = second[:, TK - 1:TK]


def _decoder_kernel_2in(mw_ref, mask_ref, w_ref, out_ref, carry_ref, **kw):
    _decoder_body(mw_ref[0] * mask_ref[0], w_ref, out_ref, carry_ref, **kw)


def _decoder_kernel_1in(src_ref, w_ref, out_ref, carry_ref, **kw):
    _decoder_body(src_ref[0], w_ref, out_ref, carry_ref, **kw)


# -----------------------------------------------------------------------------
# Wrapper
# -----------------------------------------------------------------------------
def _chip_config():
    """Generation-aware defaults: K-tile size, scoped-VMEM cap, DMA depth, cores."""
    kind = ""
    try:
        kind = jax.devices()[0].device_kind.lower()
    except Exception:
        pass
    if ("v5 lite" in kind) or ("v5e" in kind) or ("v5litepod" in kind):
        cfg = dict(tk=2048, vmem_cap=96 << 20, buffers=3, cores=1)   # 128 MiB VMEM, slow HBM
    elif "v6" in kind:
        cfg = dict(tk=4096, vmem_cap=96 << 20, buffers=2, cores=1)   # 128 MiB VMEM
    elif ("v7" in kind) or ("tpu7" in kind) or ("7x" in kind):
        cfg = dict(tk=2048, vmem_cap=48 << 20, buffers=2, cores=2)   # 64 MiB VMEM, 2 TCs
    else:
        cfg = dict(tk=2048, vmem_cap=48 << 20, buffers=2, cores=1)
    try:  # refine the cap from the actual part when the query is available
        phys = int(getattr(pltpu.get_tpu_info(), "vmem_capacity_bytes", 0))
        if phys > 0:
            cfg["vmem_cap"] = min(cfg["vmem_cap"], (phys * 3) // 4)
    except Exception:
        pass
    return cfg


def decoder_forward(mixture_w, est_mask, weight, *, tk=None, out_dtype=jnp.float32,
                    buffer_count=None, lowp_matmul=False, k_chunks=None):
    """SEANet Decoder forward: (mixture_w * est_mask) -> Linear(N, L, bias=False)
    -> 50% overlap-and-add, returning the [B, L//2*(K-1) + L] waveform.

    mixture_w : [B, N, K]  (if est_mask is None this is the pre-multiplied source)
    est_mask  : [B, N, K] or None (None = producer already fused the mask multiply)
    weight    : [L, N]     torch nn.Linear(N, L, bias=False) layout
    """
    mixture_w = jnp.asarray(mixture_w)
    B, N, K = mixture_w.shape
    weight = jnp.asarray(weight)
    L = weight.shape[0]
    assert weight.shape == (L, N) and L % 2 == 0
    H = L // 2
    Hp = _round_up(H, 8)
    Lp = 2 * Hp

    streams = [mixture_w] if est_mask is None else [mixture_w, jnp.asarray(est_mask)]
    n_stream = len(streams)
    in_dtype = jnp.result_type(*[s.dtype for s in streams])
    in_bytes = max(jnp.dtype(s.dtype).itemsize for s in streams)
    out_dtype = jnp.dtype(out_dtype)

    cfg = _chip_config()
    if tk is None:
        tk = cfg["tk"]
    bufs = int(buffer_count) if buffer_count is not None else int(cfg["buffers"])
    bufs = max(2, bufs)

    # Merge the two weight halves into one sublane-aligned [Lp, N] operand so each src
    # tile goes through the MXU once (rows H..Hp-1 and Hp+H..Lp-1 are zero).
    w_dtype = jnp.bfloat16 if lowp_matmul else in_dtype
    w_merged = jnp.zeros((Lp, N), dtype=w_dtype)
    w_merged = w_merged.at[:H].set(weight[:H].astype(w_dtype))
    w_merged = w_merged.at[Hp:Hp + H].set(weight[H:].astype(w_dtype))

    # ---- K tiling (no HBM padding of inputs; tail masked in-kernel) ----------------
    TK = max(128, _round_up(min(int(tk), K + 1), 128))

    def vmem_est(tk_):
        est = n_stream * bufs * N * tk_ * in_bytes        # streamed input tiles
        est += 2 * H * tk_ * out_dtype.itemsize           # output tile (double buffered)
        est += 2 * Lp * N * 4                             # resident weight
        est += 2 * N * tk_ * 4                            # src product / masked temp
        est += (Lp + 4 * H) * tk_ * 4                     # matmul result + OLA temps
        return est + (1 << 15)

    while TK > 128 and vmem_est(TK) > cfg["vmem_cap"]:
        TK = max(128, _round_up(TK // 2, 128))

    KT = _cdiv(K + 1, TK)          # tiles needed to cover output columns 0..K
    in_tiles = _cdiv(K, TK)        # tiles that touch real input data (>= 1)

    # Optional split of the K-tile range across TensorCores (useful when B == 1 on a
    # 2-core part); each chunk owns its own carry, the single seam column per chunk
    # boundary is fixed in the wrapper below.
    if k_chunks is None:
        C = cfg["cores"] if (B == 1 and cfg["cores"] > 1 and KT >= cfg["cores"]) else 1
    else:
        C = max(1, min(int(k_chunks), KT))
    KT_c = _cdiv(KT, C)
    K_out = C * KT_c * TK          # >= K + 1

    stream_kwargs = dict(pipeline_mode=pl.Buffered(bufs)) if bufs > 2 else {}

    def in_idx(b, c, kt):
        # Clamp so a tile that only produces padding columns re-reads an in-bounds
        # block (its data is fully masked in-kernel anyway) -> no fully-OOB DMA.
        return (b, 0, jnp.minimum(c * KT_c + kt, in_tiles - 1))

    def out_idx(b, c, kt):
        return (b, 0, c * KT_c + kt)

    in_specs = [pl.BlockSpec((1, N, TK), in_idx, **stream_kwargs) for _ in streams]
    in_specs.append(pl.BlockSpec((Lp, N), lambda b, c, kt: (0, 0)))
    out_spec = pl.BlockSpec((1, H, TK), out_idx)

    kern = _decoder_kernel_1in if est_mask is None else _decoder_kernel_2in
    kern = functools.partial(kern, K=K, TK=TK, KT_c=KT_c, H=H, Hp=Hp)

    vmem_limit = int(min(max((vmem_est(TK) * 5) // 4, 32 << 20), cfg["vmem_cap"]))

    cost = pl.CostEstimate(
        flops=2 * B * N * Lp * K_out,
        transcendentals=0,
        bytes_accessed=n_stream * B * N * K * in_bytes
        + Lp * N * w_merged.dtype.itemsize
        + B * H * K_out * out_dtype.itemsize)

    out_t = pl.pallas_call(
        kern,
        out_shape=jax.ShapeDtypeStruct((B, H, K_out), out_dtype),
        grid=(B, C, KT_c),
        in_specs=in_specs,
        out_specs=out_spec,
        scratch_shapes=[pltpu.VMEM((H, 1), jnp.float32)],        # OLA seam carry
        compiler_params=pltpu.CompilerParams(
            dimension_semantics=("parallel", "parallel", "arbitrary"),
            vmem_limit_bytes=vmem_limit),
        cost_estimate=cost,
    )(*streams, w_merged)

    # Fix the single missing half-frame at every chunk boundary (tiny wrapper matvec).
    if C > 1:
        w2 = weight[H:].astype(jnp.float32)                      # [H, N]
        for ci in range(1, C):
            s = ci * KT_c * TK
            if s <= K:
                col = streams[0][:, :, s - 1]
                if est_mask is not None:
                    col = col * streams[1][:, :, s - 1]
                contrib = col.astype(jnp.float32) @ w2.T         # [B, H]
                out_t = out_t.at[:, :, s].add(contrib.astype(out_t.dtype))

    # [B, H, K+1] -> [B, K+1, H] -> waveform [B, (K+1)*H] == [B, L//2*(K-1) + L].
    # TODO(synk): fold this transpose/reshape into the downstream consumer to avoid a
    # standalone HBM round trip of the (small) output.
    return jnp.swapaxes(out_t[:, :, :K + 1], 1, 2).reshape(B, (K + 1) * H)


# -----------------------------------------------------------------------------
# Pure-JAX reference (matches the PyTorch Decoder + overlap_and_add)
# -----------------------------------------------------------------------------
def decoder_reference(mixture_w, est_mask, weight):
    src = mixture_w * est_mask                       # [B, N, K]
    src = jnp.swapaxes(src, 1, 2)                    # [B, K, N]
    frames = src @ jnp.asarray(weight).T             # [B, K, L]
    B, K, L = frames.shape
    H = L // 2
    out = jnp.zeros((B, K + 1, H), dtype=frames.dtype)
    out = out.at[:, :K, :].add(frames[:, :, :H])
    out = out.at[:, 1:, :].add(frames[:, :, H:])
    return out.reshape(B, -1)


if __name__ == "__main__":
    def make_case(key, B, N, K, L):
        k_w, k_mw, k_mask = jax.random.split(key, 3)
        bound = 1.0 / (N ** 0.5)
        weight = jax.random.uniform(k_w, (L, N), minval=-bound, maxval=bound,
                                    dtype=jnp.float32)
        mixture_w = jax.random.normal(k_mw, (B, N, K), dtype=jnp.float32)
        est_mask = jax.random.uniform(k_mask, (B, N, K), dtype=jnp.float32)
        return weight, mixture_w, est_mask

    def check(out, ref, atol, tag):
        out = jax.block_until_ready(out)
        assert out.shape == ref.shape, (tag, out.shape, ref.shape)
        err = float(jnp.max(jnp.abs(out.astype(jnp.float32) - ref)))
        assert err <= atol, (tag, err)

    root = jax.random.PRNGKey(0)
    k1, k2, k3 = jax.random.split(root, 3)

    # Case A: H multiple of 8 (L=16), K=200 (in-kernel tail mask), all code paths.
    wA, mwA, mkA = make_case(k1, 2, 32, 200, 16)
    refA = decoder_reference(mwA, mkA, wA)

    check(decoder_forward(mwA, mkA, wA), refA, 1e-4, "default-tk")
    check(decoder_forward(mwA, mkA, wA, tk=128), refA, 1e-4, "multi-tile-carry")
    check(decoder_forward(mwA, mkA, wA, tk=128, k_chunks=2), refA, 1e-4, "k-chunk-seam")
    check(decoder_forward(mwA * mkA, None, wA, tk=128), refA, 1e-4, "fused-src")

    # bf16 producers (no wrapper casts: the kernel streams whatever dtype it is given)
    # plus bf16 output to halve output traffic; loose tolerance vs. the f32 reference.
    out_bf16 = decoder_forward(mwA.astype(jnp.bfloat16), mkA.astype(jnp.bfloat16), wA,
                               tk=128, out_dtype=jnp.bfloat16)
    check(out_bf16, refA, 1e-1, "bf16-stream")

    # Low-precision MXU path (v5e-style in-kernel bf16 cast of f32-streamed data).
    check(decoder_forward(mwA, mkA, wA, tk=128, lowp_matmul=True), refA, 1e-1,
          "lowp-matmul")

    # Case B: K % TK == 0 exercises the clamped (padding-only) final tile.
    wB, mwB, mkB = make_case(k2, 2, 32, 256, 16)
    check(decoder_forward(mwB, mkB, wB, tk=128), decoder_reference(mwB, mkB, wB),
          1e-4, "k-divisible")

    # Case C: real-model filter length L=40 (H=20 -> sublane-padded merged weight),
    # explicit 3-deep input buffering.
    wC, mwC, mkC = make_case(k3, 2, 64, 200, 40)
    check(decoder_forward(mwC, mkC, wC, tk=128, buffer_count=3),
          decoder_reference(mwC, mkC, wC), 1e-4, "odd-H-buffered")

    # TODO(synk): the rest of seanet (Encoder conv, pretrained VisualFrontend, LSTM /
    # attention separator) is outside this kernel; only the Decoder forward is in Pallas.
    print("KERNEL_OK")
</pallas_src>

<mosaic_0001>
module attributes {stable_mosaic.version = 11 : i64} {
  func.func @_decoder_kernel_2in(%arg0: i32, %arg1: i32, %arg2: i32, %arg3: memref<1x32x256xf32, #tpu.memory_space<vmem>>, %arg4: memref<1x32x256xf32, #tpu.memory_space<vmem>>, %arg5: memref<16x32xf32, #tpu.memory_space<vmem>>, %arg6: memref<1x8x256xf32, #tpu.memory_space<vmem>>, %arg7: memref<8x1xf32, #tpu.memory_space<vmem>>) attributes {dimension_semantics = [#tpu.dimension_semantics<parallel>, #tpu.dimension_semantics<parallel>, #tpu.dimension_semantics<arbitrary>], iteration_bounds = array<i64: 2, 1, 1>, scalar_prefetch = 0 : i64, scratch_operands = 1 : i64, tpu.core_type = #tpu.core_type<tc>, window_params = [{transform_indices = @transform_0, window_bounds = array<i64: 1, 32, 256>}, {transform_indices = @transform_1, window_bounds = array<i64: 1, 32, 256>}, {pipeline_mode = #tpu.pipeline_mode<synchronous>, transform_indices = @transform_2, window_bounds = array<i64: 16, 32>}, {transform_indices = @transform_3, window_bounds = array<i64: 1, 8, 256>}]} {
    %c0 = arith.constant 0 : index
    %c0_0 = arith.constant 0 : index
    %c0_1 = arith.constant 0 : index
    %0 = vector.load %arg3[%c0, %c0_0, %c0_1] : memref<1x32x256xf32, #tpu.memory_space<vmem>>, vector<1x32x256xf32>
    %1 = vector.shape_cast %0 : vector<1x32x256xf32> to vector<32x256xf32>
    %c0_2 = arith.constant 0 : index
    %c0_3 = arith.constant 0 : index
    %c0_4 = arith.constant 0 : index
    %2 = vector.load %arg4[%c0_2, %c0_3, %c0_4] : memref<1x32x256xf32, #tpu.memory_space<vmem>>, vector<1x32x256xf32>
    %3 = vector.shape_cast %2 : vector<1x32x256xf32> to vector<32x256xf32>
    %4 = arith.mulf %1, %3 : vector<32x256xf32>
    %c0_i32 = arith.constant 0 : i32
    %5 = arith.cmpi eq, %arg2, %c0_i32 : i32
    %6 = arith.extui %5 : i1 to i32
    %c0_i32_5 = arith.constant 0 : i32
    %7 = arith.cmpi ne, %6, %c0_i32_5 : i32
    scf.if %7 {
      %cst_20 = arith.constant 0.000000e+00 : f32
      %37 = vector.broadcast %cst_20 : f32 to vector<8x1xf32>
      %c0_21 = arith.constant 0 : index
      %c0_22 = arith.constant 0 : index
      %38 = vector.load %arg7[%c0_21, %c0_22] : memref<8x1xf32, #tpu.memory_space<vmem>>, vector<8x1xf32>
      tpu.vector_store %arg7[%c0_21, %c0_22], %37 {strides = array<i32>} : memref<8x1xf32, #tpu.memory_space<vmem>>, vector<8x1xf32>,
    } else {
    }
    %c1_i32 = arith.constant 1 : i32
    %8 = arith.muli %arg1, %c1_i32 : i32
    %9 = arith.addi %8, %arg2 : i32
    %c256_i32 = arith.constant 256 : i32
    %10 = arith.muli %9, %c256_i32 : i32
    %11 = tpu.iota {dimensions = array<i32: 1>} : vector<1x256xi32>
    %12 = vector.broadcast %10 : i32 to vector<1x256xi32>
    %13 = arith.addi %12, %11 : vector<1x256xi32>
    %c200_i32 = arith.constant 200 : i32
    %14 = vector.broadcast %c200_i32 : i32 to vector<1x256xi32>
    %15 = arith.cmpi slt, %13, %14 : vector<1x256xi32>
    %cst = arith.constant 0.000000e+00 : f32
    %16 = vector.broadcast %cst : f32 to vector<32x256xf32>
    %17 = vector.shape_cast %15 : vector<1x256xi1> to vector<1x256xi1>
    %18 = vector.broadcast %17 : vector<1x256xi1> to vector<32x256xi1>
    %19 = arith.select %18, %4, %16 : vector<32x256xi1>, vector<32x256xf32>
    %c0_6 = arith.constant 0 : index
    %c0_7 = arith.constant 0 : index
    %20 = vector.load %arg5[%c0_6, %c0_7] : memref<16x32xf32, #tpu.memory_space<vmem>>, vector<16x32xf32>
    %cst_8 = arith.constant dense<0.000000e+00> : vector<16x256xf32>
    %21 = tpu.matmul %20, %19, %cst_8 {dimension_numbers = #tpu.dot_dimension_numbers<[1], [0], [0], [1], [0, 0, 1, 1], [], []>} : vector<16x32xf32>, vector<32x256xf32>, vector<16x256xf32> -> vector<16x256xf32>
    %22 = vector.extract_strided_slice %21 {offsets = [0, 0], sizes = [8, 256], strides = [1, 1]} : vector<16x256xf32> to vector<8x256xf32>
    %23 = vector.extract_strided_slice %21 {offsets = [8, 0], sizes = [8, 256], strides = [1, 1]} : vector<16x256xf32> to vector<8x256xf32>
    %c1_i32_9 = arith.constant 1 : i32
    %24 = tpu.dynamic_rotate %23 by %c1_i32_9 dim 1 : vector<8x256xf32>, i32 -> vector<8x256xf32>
    %25 = arith.addf %22, %24 : vector<8x256xf32>
    %c0_10 = arith.constant 0 : index
    %c0_11 = arith.constant 0 : index
    %c0_12 = arith.constant 0 : index
    %26 = vector.load %arg6[%c0_10, %c0_11, %c0_12] : memref<1x8x256xf32, #tpu.memory_space<vmem>>, vector<1x8x256xf32>
    %27 = vector.shape_cast %26 : vector<1x8x256xf32> to vector<8x256xf32>
    %28 = vector.shape_cast %25 : vector<8x256xf32> to vector<1x8x256xf32>
    tpu.vector_store %arg6[%c0_10, %c0_11, %c0_12], %28 {strides = array<i32>} : memref<1x8x256xf32, #tpu.memory_space<vmem>>, vector<1x8x256xf32>,
    %29 = vector.extract_strided_slice %22 {offsets = [0, 0], sizes = [8, 1], strides = [1, 1]} : vector<8x256xf32> to vector<8x1xf32>
    %c0_13 = arith.constant 0 : index
    %c0_14 = arith.constant 0 : index
    %30 = vector.load %arg7[%c0_13, %c0_14] : memref<8x1xf32, #tpu.memory_space<vmem>>, vector<8x1xf32>
    %31 = arith.addf %29, %30 : vector<8x1xf32>
    %c0_15 = arith.constant 0 : index
    %c0_16 = arith.constant 0 : index
    %c0_17 = arith.constant 0 : index
    %32 = vector.load %arg6[%c0_15, %c0_16, %c0_17] : memref<1x8x256xf32, #tpu.memory_space<vmem>>, vector<1x8x1xf32>
    %33 = vector.shape_cast %32 : vector<1x8x1xf32> to vector<8x1xf32>
    %34 = vector.shape_cast %31 : vector<8x1xf32> to vector<1x8x1xf32>
    tpu.vector_store %arg6[%c0_15, %c0_16, %c0_17], %34 {strides = array<i32>} : memref<1x8x256xf32, #tpu.memory_space<vmem>>, vector<1x8x1xf32>,
    %35 = vector.extract_strided_slice %23 {offsets = [0, 255], sizes = [8, 1], strides = [1, 1]} : vector<8x256xf32> to vector<8x1xf32>
    %c0_18 = arith.constant 0 : index
    %c0_19 = arith.constant 0 : index
    %36 = vector.load %arg7[%c0_18, %c0_19] : memref<8x1xf32, #tpu.memory_space<vmem>>, vector<8x1xf32>
    tpu.vector_store %arg7[%c0_18, %c0_19], %35 {strides = array<i32>} : memref<8x1xf32, #tpu.memory_space<vmem>>, vector<8x1xf32>,
    return
  }
  func.func @transform_0(%arg0: i32, %arg1: i32, %arg2: i32) -> (i32, i32, i32) {
    %c1_i32 = arith.constant 1 : i32
    %0 = arith.muli %arg1, %c1_i32 : i32
    %1 = arith.addi %0, %arg2 : i32
    %c0_i32 = arith.constant 0 : i32
    %2 = arith.minsi %1, %c0_i32 : i32
    %c0_i32_0 = arith.constant 0 : i32
    %c0_i32_1 = arith.constant 0 : i32
    return %arg0, %c0_i32_0, %2 : i32, i32, i32
  }
  func.func @transform_1(%arg0: i32, %arg1: i32, %arg2: i32) -> (i32, i32, i32) {
    %c1_i32 = arith.constant 1 : i32
    %0 = arith.muli %arg1, %c1_i32 : i32
    %1 = arith.addi %0, %arg2 : i32
    %c0_i32 = arith.constant 0 : i32
    %2 = arith.minsi %1, %c0_i32 : i32
    %c0_i32_0 = arith.constant 0 : i32
    %c0_i32_1 = arith.constant 0 : i32
    return %arg0, %c0_i32_0, %2 : i32, i32, i32
  }
  func.func @transform_2(%arg0: i32, %arg1: i32, %arg2: i32) -> (i32, i32) {
    %c0_i32 = arith.constant 0 : i32
    %c0_i32_0 = arith.constant 0 : i32
    %c0_i32_1 = arith.constant 0 : i32
    return %c0_i32, %c0_i32_0 : i32, i32
  }
  func.func @transform_3(%arg0: i32, %arg1: i32, %arg2: i32) -> (i32, i32, i32) {
    %c1_i32 = arith.constant 1 : i32
    %0 = arith.muli %arg1, %c1_i32 : i32
    %1 = arith.addi %0, %arg2 : i32
    %c0_i32 = arith.constant 0 : i32
    %c0_i32_0 = arith.constant 0 : i32
    return %arg0, %c0_i32, %1 : i32, i32, i32
  }
}

</mosaic_0001>

<bundles_post_ra>
// kernel: tpu_custom_call.1
= control target key start
LH: loop header
LB: loop body
LE: loop exit
PB: predicated region body
PF: predicated region fallthrough
CT: control target
= control target key end

     0   :  { %s1245_s0 = inlined_call_operand.hbm [shape: f32[2,32,200], index: 0, kind: input, shape index: {}]   ;;  %s1246_s1 = inlined_call_operand.hbm [shape: f32[2,32,200], index: 1, kind: input, shape index: {}]   ;;  %s1247_s2 = inlined_call_operand.hbm [shape: f32[16,32], index: 2, kind: input, shape index: {}]   ;;  %s1248_s3 = inlined_call_operand.hbm [shape: f32[2,8,256], index: 3, kind: output, shape index: {}]  }
   0x1   :  { %1252 = sst [smem:[#allocation14_spill]] %s1245_s0 }
   0x2   :  { %1253 = sst [smem:[#allocation15_spill]] %s1247_s2 }
   0x3   :  { %8 = vsyncpa [#allocation4], 0 }
   0x4   :  { %10 = vsyncpa [#allocation4 + $0x1], 0 }
   0x5   :  { %11 = vsyncpa [#allocation7], 0 }
   0x6   :  { %13 = vsyncpa [#allocation7 + $0x1], 0 }
   0x7   :  { %14 = vsyncpa [#allocation5], 0 }
   0x8   :  { %16 = vsyncpa [#allocation5 + $0x1], 0  ;;  %s939_s12 = smov 0   ;;  %s941_s13 = smov 0  }
   0x9   :  { %s943_s14 = smov 0   ;;  %s945_s15 = smov 0  }
   0xa   :  { %s947_s16 = smov 0   ;;  %s949_s17 = smov 0  }
   0xb LB: > { %s970_s18 = sadd.s32 4294967295, %s907_s17   ;;  %s602_s19 = sadd.s32 4294967294, %s907_s17   ;;  %s907_s17 = sphi %s949_s17, %s22_s17   ;;  %s903_s16 = sphi %s947_s16, %s1276_s16   ;;  %s899_s15 = sphi %s945_s15, %s1275_s15   ;;  %s895_s14 = sphi %s943_s14, %s1274_s14   ;;  %s891_s13 = sphi %s941_s13, %s1273_s13   ;;  %s887_s12 = sphi %s939_s12, %s1272_s12  }
   0xc   : > { %p69_p0 = scmp.ne.s32.totalorder %s891_s13, %s887_s12  ;;  %p1249_p1 = scmp.eq.s32.totalorder %s970_s18, 0 }
   0xd   : > { %p158_p3 = scmp.eq.s32.totalorder %s602_s19, 1  ;;  %p603_p5 = scmp.ge.s32.totalorder %s907_s17, 1 }
   0xe   : > { %p979_p4 = por %p1249_p1, %p69_p0  ;;  %p165_p7 = scmp.lt.s32.totalorder %s907_s17, 3 }
   0xf   : > { %p984_p6 = por %p158_p3, %p69_p0  ;;  %s909_s23 = smov [#allocation8]  }
  0x10   : > { %s1254_s20 = scalar_select %p979_p4, 1, 0 }
  0x11   : > { %s1255_s21 = scalar_select %p984_p6, 1, 0 }
  0x12   : > { %p989_p8 = pnand %p603_p5, %p165_p7  ;;  %s177_s24 = sshll.u32 %s909_s23, 4  ;;  %s178_s24 = int_to_ptr.vmem [resolvable:$true] %s177_s24 }
  0x13   : > { %s41_s26 = sadd.s32 1, %s903_s16  ;;  %s1258_s2 = sld [smem:[#allocation15_spill]] }
  0x14   : > { %s1256_s22 = scalar_select %p989_p8, 1, 0 }
  0x15   : > { %p655_p9 = pneg %p989_p8 }
  0x17   : > { %p998_p11 = pnand %p655_p9, %p1249_p1 }
  0x19   : > { %s729_s29 = scalar_lea.hbm %s1258_s2, 256  ;;  %p731_p13 = pneg %p998_p11 }
  0x1a   : > { %p730_p12 = scmp.ne.s32.totalorder %s1258_s2, %s729_s29  ;;  %p736_p5 = scmp.lt.u32.totalorder %s729_s29, %s1258_s2 }
  0x1c   : > { %p732_p0 = pnand %p731_p13, %p730_p12 }
  0x1e   : > { %p733_p3 = pneg %p732_p0 }
  0x20   : > { %p738_p7 = pnand %p736_p5, %p733_p3 }
  0x22   : > { %741 = shalt.err (!%p738_p7)
}
  0x23   : > { %s742_s7 = scalar_lea.vmem %s178_s24, 256  ;;  %p750_p2 = scmp.lt.s32.totalorder %s178_s24, %s178_s24 }
  0x24   : > { %p743_p9 = scmp.ne.s32.totalorder %s178_s24, %s742_s7  ;;  %p751_p6 = scmp.lt.s32.totalorder %s742_s7, %s742_s7 }
  0x26   : > { %p745_p10 = pnand %p743_p9, %p731_p13  ;;  %p752_p4 = por %p751_p6, %p750_p2 }
  0x28   : > { %p746_p1 = pneg %p745_p10 }
  0x2a   : > { %p753_p8 = pnand %p752_p4, %p746_p1 }
  0x2c   : > { %756 = shalt.err (!%p753_p8)
}
  0x2d   : > { %s910_s8 = smov 128   ;;  %s911_s9 = smov 8  }
  0x2e   : > { %658 = dma.hbm_to_vmem [thread:$0]  (!%p998_p11), %s1258_s2, 256, %s178_s24, [#allocation7], %s910_s8, %s910_s8, %s911_s9  }
  0x2f   : > { %p43_p1 = scmp.ge.s32.totalorder %s41_s26, 2  ;;  %s56_s19 = sadd.s32 1, %s895_s14 }
  0x30   : > { %p63_p2 = scmp.ne.s32.totalorder %s895_s14, %s891_s13  ;;  %p64_p4 = scmp.eq.s32.totalorder %s907_s17, 0 }
  0x31   : > { %s1278_s26 = smov (%p43_p1, %s41_s26), 0  ;;  %p1260_p8 = scmp.eq.s32.totalorder %s970_s18, 1 }
  0x32   : > { %p1025_p6 = por %p64_p4, %p63_p2  ;;  %s51_s27 = ssub.s32 %s903_s16, %s1278_s26 }
  0x33   : > { %p1031_p10 = por %p1260_p8, %p63_p2  ;;  %p671_p12 = scmp.lt.s32.totalorder %s907_s17, 2 }
  0x34   : > { %p54_p11 = scmp.eq.s32.totalorder %s51_s27, 0  ;;  %s191_s24 = sand.u32 1, %s895_s14  }
  0x35   : > { %s1039_s28 = sshll.u32 %s191_s24, 6  ;;  %s628_s30 = sshll.u32 %s903_s16, 10 }
  0x36   : > { %s1042_s29 = scalar_select %p54_p11, %s895_s14, %s56_s19  }
  0x37   : > { %s1262_s0 = sld [smem:[#allocation14_spill]]  ;;  %s195_s7 = scalar_lea.vmem [#allocation3], %s1039_s28 }
  0x38   : > { %s207_s8 = sshll.u32 %s195_s7, 4  ;;  %p1057_p13 = pnand %p671_p12, %p1025_p6  ;;  %s1053_s8 = int_to_ptr.vmem [resolvable:$true] %s207_s8 }
  0x39   : > { %s1061_s10 = scalar_lea.sflag [#allocation4], %s191_s24 }
  0x3a   : > { %p759_p3 = pneg %p1057_p13 }
  0x3d   : > { %s1050_s6 = scalar_lea.hbm %s1262_s0, %s628_s30  ;;  %s762_s23 = scalar_lea.hbm %s1262_s0, 2048 }
  0x3e   : > { %s757_s11 = scalar_lea.hbm %s1050_s6, 1024  ;;  %p763_p9 = scmp.lt.u32.totalorder %s1050_s6, %s1262_s0 }
  0x3f   : > { %p758_p0 = scmp.ne.s32.totalorder %s1050_s6, %s757_s11  ;;  %p764_p1 = scmp.lt.u32.totalorder %s762_s23, %s757_s11 }
  0x40   : > { %p766_p4 = scmp.lt.u32.totalorder %s757_s11, %s1050_s6 }
  0x41   : > { %p760_p5 = pnand %p759_p3, %p758_p0  ;;  %p765_p2 = por %p764_p1, %p763_p9 }
  0x43   : > { %p761_p7 = pneg %p760_p5  ;;  %p767_p6 = por %p766_p4, %p765_p2 }
  0x45   : > { %p768_p8 = pnand %p767_p6, %p761_p7 }
  0x47   : > { %771 = shalt.err (!%p768_p8)
}
  0x48   : > { %s772_s24 = scalar_lea.vmem %s1053_s8, 1024  ;;  %s912_s7 = smov [#allocation3]  }
  0x49   : > { %p773_p12 = scmp.ne.s32.totalorder %s1053_s8, %s772_s24  ;;  %s777_s19 = sshll.u32 %s912_s7, 4  ;;  %s778_s19 = int_to_ptr.vmem [resolvable:$false] %s777_s19 }
  0x4a   : > { %s779_s27 = scalar_lea.vmem %s778_s19, 2048  ;;  %p780_p5 = scmp.lt.s32.totalorder %s1053_s8, %s778_s19 }
  0x4b   : > { %p775_p11 = pnand %p773_p12, %p759_p3  ;;  %p781_p9 = scmp.lt.s32.totalorder %s779_s27, %s772_s24 }
  0x4d   : > { %p776_p0 = pneg %p775_p11  ;;  %p782_p1 = por %p781_p9, %p780_p5 }
  0x4f   : > { %p783_p2 = pnand %p782_p1, %p776_p0 }
  0x51   : > { %786 = shalt.err (!%p783_p2)
}
  0x52   : > { %s913_s11 = smov 256   ;;  %s914_s23 = smov 16  }
  0x53   : > { %662 = dma.hbm_to_vmem [thread:$0]  (!%p1057_p13), %s1050_s6, 1024, %s1053_s8, %s1061_s10, %s913_s11, %s913_s11, %s914_s23  }
  0x54   : > { %s1097_s24 = scalar_lea.hbm %s1246_s1, %s628_s30  ;;  %s221_s7 = scalar_lea.vmem [#allocation6], %s1039_s28 }
  0x55   : > { %s233_s19 = sshll.u32 %s221_s7, 4  ;;  %s217_s27 = sand.u32 1, %s907_s17   ;;  %s1100_s19 = int_to_ptr.vmem [resolvable:$true] %s233_s19 }
  0x56   : > { %s1103_s0 = scalar_lea.sflag [#allocation7], %s217_s27  ;;  %s787_s2 = scalar_lea.hbm %s1097_s24, 1024 }
  0x57   : > { %p788_p7 = scmp.ne.s32.totalorder %s1097_s24, %s787_s2  ;;  %s792_s8 = scalar_lea.hbm %s1246_s1, 2048 }
  0x58   : > { %p793_p8 = scmp.lt.u32.totalorder %s1097_s24, %s1246_s1  ;;  %p794_p12 = scmp.lt.u32.totalorder %s792_s8, %s787_s2 }
  0x59   : > { %p790_p4 = pnand %p788_p7, %p759_p3  ;;  %p796_p0 = scmp.lt.u32.totalorder %s787_s2, %s1097_s24 }
  0x5a   : > { %p795_p11 = por %p794_p12, %p793_p8 }
  0x5b   : > { %p791_p6 = pneg %p790_p4 }
  0x5c   : > { %p797_p5 = por %p796_p0, %p795_p11 }
  0x5e   : > { %p798_p9 = pnand %p797_p5, %p791_p6 }
  0x60   : > { %801 = shalt.err (!%p798_p9)
}
  0x61   : > { %s802_s28 = scalar_lea.vmem %s1100_s19, 1024  ;;  %s915_s5 = smov [#allocation6]  }
  0x62   : > { %p803_p1 = scmp.ne.s32.totalorder %s1100_s19, %s802_s28  ;;  %s807_s7 = sshll.u32 %s915_s5, 4  ;;  %s808_s7 = int_to_ptr.vmem [resolvable:$false] %s807_s7 }
  0x63   : > { %s809_s27 = scalar_lea.vmem %s808_s7, 2048  ;;  %p810_p4 = scmp.lt.s32.totalorder %s1100_s19, %s808_s7 }
  0x64   : > { %p805_p2 = pnand %p803_p1, %p759_p3  ;;  %p811_p8 = scmp.lt.s32.totalorder %s809_s27, %s802_s28 }
  0x66   : > { %p806_p7 = pneg %p805_p2  ;;  %p812_p12 = por %p811_p8, %p810_p4 }
  0x68   : > { %p813_p11 = pnand %p812_p12, %p806_p7 }
  0x6a   : > { %816 = shalt.err (!%p813_p11)
}
  0x6b   : > { %665 = dma.hbm_to_vmem [thread:$0]  (!%p1057_p13), %s1097_s24, 1024, %s1100_s19, %s1103_s0, %s913_s11, %s913_s11, %s914_s23  }
  0x6c   : > { %p1264_p3 = scmp.ne.s32.totalorder %s1256_s22, 0 }
  0x6d   : > { %s1135_s2 = sand.u32 (!%p1264_p3), 1, %s891_s13   ;;  %p1265_p6 = scmp.ne.s32.totalorder (!%p1264_p3), %s1254_s20, 0 }
  0x6e   : > { %245 = sbr.rel (%p1264_p3) target bundleno = 489 (0x1e9), region = 32  ;;  %s613_s6 = sshll.u32 (!%p1264_p3), %s1135_s2, 6 }
  0x6f   : > { %s248_s30 = scalar_lea.sflag (!%p1264_p3), [#allocation4], %s1135_s2  ;;  %s1139_s8 = scalar_lea.vmem (!%p1264_p3), [#allocation3], %s613_s6 }
  0x75   : > { %870 = dma.done.wait (%p1265_p6), %s248_s30, 1024  }
  0x76   : > { %872 = vsyncadd (%p1265_p6), %s248_s30, 4294966272  ;;  %s256_s0 = sand.u32 1, %s970_s18   ;;  %s1146_s9 = scalar_lea.vmem [#allocation6], %s613_s6 }
  0x77   : > { %s257_s22 = scalar_lea.sflag [#allocation7], %s256_s0 }
  0x78   : > { %874 = dma.done.wait (%p1265_p6), %s257_s22, 1024  }
  0x79   : > { %876 = vsyncadd (%p1265_p6), %s257_s22, 4294966272  ;;  %p1266_p13 = scmp.eq.s32.totalorder %s970_s18, 0 }
  0x7b   : > { %878 = dma.done.wait (%p1266_p13), [#allocation7], 256   ;;  %p1267_p0 = pmov %p1266_p13 }
  0x7c   : > { %v334_v0 = vlaneseq  ;;  %vm330_vm0 = vcmask 7168   ;;  %v916_v1 = vmov 0.0   ;;  %v303_v4 = vld [vmem:[%s1139_s8 + $0x8] sm:$0xff]  ;;  %v305_v5 = vld [vmem:[%s1139_s8 + $0x18] sm:$0xff]  ;;  %v302_v10 = vld [vmem:[%s1139_s8] sm:$0xff]  ;;  %vm356_vm3 = vcmask 261120  }
  0x7d   : > { %880 = vsyncadd (%p1267_p0), [#allocation7], 4294967040  ;;  %331 = vst.msk [vmem:[#allocation2] sm:$0xff] %vm330_vm0, %v916_v1  ;;  %433 = vmatprep.mubr.f32.mxu1 %v916_v1  ;;  %427 = vmatprep.mubr.f32.mxu0 %v916_v1  ;;  %v311_v6 = vld [vmem:[%s1146_s9 + $0x8] sm:$0xff]  ;;  %v313_v7 = vld [vmem:[%s1146_s9 + $0x18] sm:$0xff]  ;;  %s917_s18 = smov 1  }
  0x7e   : > { %v1157_v2 = vand.u32 127, %v334_v0  ;;  %v319_v8 = vmul.f32 %v311_v6, %v303_v4  ;;  %v321_v11 = vmul.f32 %v313_v7, %v305_v5  ;;  %v304_v12 = vld [vmem:[%s1139_s8 + $0x10] sm:$0xff]  ;;  %v310_v13 = vld [vmem:[%s1146_s9] sm:$0xff]  ;;  %v307_v17 = vld [vmem:[%s1139_s8 + $0x28] sm:$0xff]  ;;  %s616_s20 = sshll.u32 %s1135_s2, 4  ;;  %s630_s11 = sshll.u32 %s899_s15, 8 }
  0x7f   : > { %v312_v14 = vld [vmem:[%s1146_s9 + $0x10] sm:$0xff]  ;;  %v318_v15 = vmul.f32 %v310_v13, %v302_v10  ;;  %v309_v18 = vld [vmem:[%s1139_s8 + $0x38] sm:$0xff]  ;;  %v315_v19 = vld [vmem:[%s1146_s9 + $0x28] sm:$0xff]  ;;  %s291_s23 = scalar_lea.vmem [#allocation9], %s616_s20  ;;  %s1195_s4 = scalar_lea.hbm %s1248_s3, %s630_s11 }
  0x80   : > { %v336_v3 = vadd.s32 128, %v1157_v2  ;;  %v320_v16 = vmul.f32 %v312_v14, %v304_v12  ;;  %v631_v20 = vpack.c.bf16 %v321_v11, %v319_v8  ;;  %v317_v21 = vld [vmem:[%s1146_s9 + $0x38] sm:$0xff]  ;;  %v323_v22 = vmul.f32 %v315_v19, %v307_v17  ;;  %v306_v23 = vld [vmem:[%s1139_s8 + $0x20] sm:$0xff]  ;;  %v308_v24 = vld [vmem:[%s1139_s8 + $0x30] sm:$0xff]  ;;  %s478_s24 = sshll.u32 %s291_s23, 4  ;;  %s461_s15 = scalar_lea.sflag [#allocation5], %s1135_s2  ;;  %s1197_s24 = int_to_ptr.vmem [resolvable:$true] %s478_s24 }
  0x81   : > { %v325_v26 = vmul.f32 %v317_v21, %v309_v18  ;;  %v314_v27 = vld [vmem:[%s1146_s9 + $0x20] sm:$0xff]  ;;  %v316_v28 = vld [vmem:[%s1146_s9 + $0x30] sm:$0xff]  ;;  %v355_v33 = vld [vmem:[#allocation8 + $0x8] sm:$0xff]  ;;  %vm444_vm4 = vcmp.lt.s32.totalorder %v1157_v2, 1  ;;  %s817_s28 = scalar_lea.vmem %s1197_s24, 256  ;;  %s918_s5 = smov [#allocation9]  }
  0x82   : > { %vm341_vm1 = vcmp.lt.s32.totalorder %v336_v3, 200  ;;  %v634_v25 = vpack.c.bf16 %v320_v16, %v318_v15  ;;  %v322_v29 = vmul.f32 %v314_v27, %v306_v23  ;;  %v324_v30 = vmul.f32 %v316_v28, %v308_v24  ;;  %v354_v34 = vld [vmem:[#allocation8] sm:$0xff]  ;;  %p818_p5 = scmp.ne.s32.totalorder %s1197_s24, %s817_s28  ;;  %s821_s7 = sshll.u32 %s918_s5, 4  ;;  %s822_s7 = int_to_ptr.vmem [resolvable:$false] %s821_s7 }
  0x83   : > { %vm1164_vm2 = vmpackc.low %vm341_vm1, %vm341_vm1  ;;  %v636_v31 = vpack.c.bf16 %v325_v26, %v323_v22  ;;  %s823_s27 = scalar_lea.vmem %s822_s7, 512  ;;  %p824_p2 = scmp.lt.s32.totalorder %s1197_s24, %s822_s7 }
  0x84   : > { %641 = vmatprep.subr.msk.bf16.mxu1 %vm1164_vm2, %v631_v20  ;;  %633 = vmatprep.subr.msk.bf16.mxu0 %vm1164_vm2, %v631_v20  ;;  %v639_v32 = vpack.c.bf16 %v324_v30, %v322_v29  ;;  %v451_v39 = vld [vmem:[#allocation2] sm:$0xff]  ;;  %p819_p9 = pnand %p818_p5, %p1031_p10  ;;  %p825_p7 = scmp.lt.s32.totalorder %s823_s27, %s817_s28 }
  0x85   : > { %643 = vmatpush1.bf16.msra.mxu1 %v634_v25  ;;  %635 = vmatpush1.bf16.msra.mxu0 %v634_v25 }
  0x86   : > { %642 = vmatprep.subr.msk.bf16.mxu1 %vm1164_vm2, %v636_v31  ;;  %638 = vmatprep.subr.msk.bf16.mxu0 %vm1164_vm2, %v636_v31  ;;  %p820_p1 = pneg %p819_p9  ;;  %p826_p4 = por %p825_p7, %p824_p2 }
  0x88   : > { %p827_p8 = pnand %p826_p4, %p820_p1 }
  0x89   : > { %644 = vmatpush1.bf16.msra.mxu1 %v639_v32  ;;  %640 = vmatpush1.bf16.msra.mxu0 %v639_v32 }
  0x8c   : > { %622 = vmatmul.mubr.msk.f32.vlgmr.msra.gmra.mrb[0].mxu1 %vm356_vm3, %v355_v33  ;;  %621 = vmatmul.mubr.msk.f32.vlgmr.msra.gmra.mrb[0].mxu0 %vm356_vm3, %v354_v34 }
 0x15f   : > { %v435_v35 = vpop.f32.mrb[0].mxu1  ;;  %v429_v36 = vpop.f32.mrb[0].mxu0 }
 0x160   : > { %440 = vrot.lane.b32.xlu0 %v435_v35, %s917_s18  ;;  %v437_v37 = vpop.f32.mrb[1].mxu1  ;;  %v431_v38 = vpop.f32.mrb[1].mxu0  ;;  %v452_v44 = vadd.f32 %v451_v39, %v429_v36 }
 0x161   : > { %456 = vrot.lane.b32.xlu1 %v437_v37, %s917_s18 }
 0x164   : > { %442 = vrot.lane.b32.xlu0 %v437_v37, %s917_s18 }
 0x1d2   : > { %v441_v40 = vpop.permute.xlu0 %440 }
 0x1d3   : > { %v457_v41 = vpop.permute.xlu1 %456 }
 0x1d4   : > { %459 = vst.msk [vmem:[#allocation2] sm:$0xff] %vm330_vm0, %v457_v41 }
 0x1d6   : > { %v443_v42 = vpop.permute.xlu0 %442 }
 0x1d7   : > { %v446_v43 = vsel %vm444_vm4, %v443_v42, %v441_v40  ;;  %v445_v45 = vsel %vm444_vm4, %v441_v40, %v443_v42 }
 0x1d8   : > { %v447_v46 = vadd.f32 %v446_v43, %v429_v36  ;;  %v448_v47 = vadd.f32 %v445_v45, %v431_v38 }
 0x1da   : > { %449 = vst [vmem:[%s291_s23] sm:$0xff] %v447_v46  ;;  %450 = vst [vmem:[%s291_s23 + $0x8] sm:$0xff] %v448_v47 }
 0x1db   : > { %454 = vst.msk [vmem:[%s291_s23] sm:$0xff] %vm330_vm0, %v452_v44 }
 0x1dc   : > { %830 = shalt.err (!%p827_p8)
}
 0x1dd   : > { %s831_s2 = scalar_lea.hbm %s1195_s4, 256  ;;  %s835_s8 = scalar_lea.hbm %s1248_s3, 512 }
 0x1de   : > { %p832_p12 = scmp.ne.s32.totalorder %s1195_s4, %s831_s2  ;;  %p836_p6 = scmp.lt.u32.totalorder %s1195_s4, %s1248_s3 }
 0x1df   : > { %p837_p13 = scmp.lt.u32.totalorder %s835_s8, %s831_s2  ;;  %p839_p5 = scmp.lt.u32.totalorder %s831_s2, %s1195_s4 }
 0x1e0   : > { %p833_p11 = pnand %p832_p12, %p1031_p10 }
 0x1e1   : > { %p838_p0 = por %p837_p13, %p836_p6 }
 0x1e2   : > { %p834_p3 = pneg %p833_p11 }
 0x1e3   : > { %p840_p9 = por %p839_p5, %p838_p0 }
 0x1e5   : > { %p841_p1 = pnand %p840_p9, %p834_p3 }
 0x1e7   : > { %844 = shalt.err (!%p841_p1)
}
 0x1e8   : > { %653 = dma.vmem_to_hbm [thread:$0]  (%p1031_p10), %s1197_s24, 256, %s1195_s4, %s461_s15  }
 0x1e9 PF: > { %s490_s9 = sand.u32 1, %s887_s12   ;;  %p1270_p2 = scmp.ne.s32.totalorder %s1255_s21, 0 }
 0x1ea   : > { %p1271_p7 = scmp.ge.s32.totalorder %s907_s17, 2  ;;  %s491_s18 = scalar_lea.sflag [#allocation5], %s490_s9 }
 0x1ec   : > { %p667_p4 = pnand %p1271_p7, %p1270_p2 }
 0x1ee   : > { %882 = dma.done.wait (!%p667_p4), %s491_s18, 256  }
 0x1ef   : > { %884 = vsyncadd (!%p667_p4), %s491_s18, 4294967040  ;;  %s22_s17 = sadd.s32 1, %s907_s17   ;;  %s1272_s12 = smov %s891_s13 }
 0x1f0   : > { %p19_p8 = scmp.ge.s32.totalorder %s22_s17, 4   ;;  %s1273_s13 = smov %s895_s14 }
 0x1f1   : > { %s1274_s14 = smov %s1042_s29  ;;  %s1275_s15 = smov %s903_s16 }
 0x1f2   : > { %s1276_s16 = smov %s1278_s26  ;;  %21 = sbr.rel (!%p19_p8) target bundleno = 11 (0xb), region = 98 }
 0x1f9   :  { %496 = vsyncpa [#allocation4], 1 }
 0x1fa   :  { %498 = vsyncpa [#allocation4 + $0x1], 1 }
 0x1fb   :  { %499 = vsyncpa [#allocation7], 1 }
 0x1fc   :  { %501 = vsyncpa [#allocation7 + $0x1], 1 }
 0x1fd   :  { %502 = vsyncpa [#allocation5], 1 }
 0x1fe   :  { %504 = vsyncpa [#allocation5 + $0x1], 1 }

</bundles_post_ra>
